<compile_context>
chip_gen: v7x
topology: tpu7x:2x2x1
jax: 0.10.0
libtpu: 0.0.40
codegen_flags: <defaults>
</compile_context>

<pallas_src>
import math
import random

import jax
import jax.numpy as jnp
import numpy as np
from jax import lax
from jax.experimental import pallas as pl
from jax.experimental.pallas import tpu as pltpu


# ----------------------------------------------------------------------------- helpers
def _nearest_source_indices(out_size, in_size, scale_factor):
    """ATen nearest: src = min(floor(dst * (1/scale)), in_size - 1), computed in f32."""
    dst = np.arange(out_size, dtype=np.float32)
    src = np.floor(dst * np.float32(1.0 / scale_factor)).astype(np.int32)
    return np.minimum(src, np.int32(in_size - 1))


def _pick_tile(extent, target):
    """Use the full extent when it fits in one tile, else a fixed `target` tile + cdiv grid."""
    return extent if extent <= target else target


# ----------------------------------------------------------------------------- kernels
def _w_resize_kernel(col_ref, x_ref, o_ref):
    # col_ref: (1, TW) i32  — source column index for each output column of this tile.
    # x_ref  : (TM, W_in)   — contiguous input rows (channels*rows folded into MXU M).
    # o_ref  : (TM, TW)
    w_in = x_ref.shape[1]
    tw = col_ref.shape[1]
    # One-hot column selector built in-kernel (no HBM selector traffic).
    sel = (lax.broadcasted_iota(jnp.int32, (w_in, tw), 0) == col_ref[...]).astype(x_ref.dtype)
    o_ref[...] = jnp.dot(
        x_ref[...],
        sel,
        preferred_element_type=jnp.float32,
        precision=lax.Precision.HIGHEST,
    ).astype(o_ref.dtype)


def _h_resize_kernel(row_ref, y_ref, o_ref):
    # row_ref: (THO, 1) i32     — source row index for each output row of this tile.
    # y_ref  : (1, H_in, TW)    — one channel slab of the W-resized intermediate.
    # o_ref  : (1, THO, TW)
    h_in = y_ref.shape[1]
    tho = row_ref.shape[0]
    # One-hot row selector built in-kernel.
    sel = (row_ref[...] == lax.broadcasted_iota(jnp.int32, (tho, h_in), 1)).astype(y_ref.dtype)
    out = jnp.dot(
        sel,
        y_ref[0],
        preferred_element_type=jnp.float32,
        precision=lax.Precision.HIGHEST,
    )
    o_ref[0] = out.astype(o_ref.dtype)


# ----------------------------------------------------------------------------- wrapper
def random_resize(x, scale_factor, *, tile_m=256, tile_n=256):
    """Nearest-neighbor resize: (C, H, W) -> (C, floor(H*s), floor(W*s)).

    Matches F.interpolate(x.unsqueeze(0), scale_factor=s, mode='nearest').squeeze(0).
    """
    C, H_in, W_in = x.shape
    H_out = int(math.floor(H_in * scale_factor))
    W_out = int(math.floor(W_in * scale_factor))

    col_src = jnp.asarray(_nearest_source_indices(W_out, W_in, scale_factor))[None, :]   # (1, W_out)
    row_src = jnp.asarray(_nearest_source_indices(H_out, H_in, scale_factor))[:, None]   # (H_out, 1)

    # ------------------- Pass 1: W resize on the free (C*H_in, W_in) row-major view.
    M = C * H_in
    x2 = x.reshape(M, W_in)
    tm = _pick_tile(M, tile_m)
    tw = _pick_tile(W_out, tile_n)
    n_m = pl.cdiv(M, tm)
    n_w = pl.cdiv(W_out, tw)

    y2 = pl.pallas_call(
        _w_resize_kernel,
        out_shape=jax.ShapeDtypeStruct((M, W_out), x.dtype),
        grid=(n_m, n_w),  # w innermost -> the (tm, W_in) row-slab stays resident across w tiles
        in_specs=[
            pl.BlockSpec((1, tw), lambda m, w: (0, w)),        # tiny i32 column-index row
            pl.BlockSpec((tm, W_in), lambda m, w: (m, 0)),     # contiguous input rows
        ],
        out_specs=pl.BlockSpec((tm, tw), lambda m, w: (m, w)),
        compiler_params=pltpu.CompilerParams(
            dimension_semantics=("parallel", "parallel"),
        ),
    )(col_src, x2)

    # ------------------- Pass 2: H resize; emits (C, H_out, W_out) directly (no transposes).
    y3 = y2.reshape(C, H_in, W_out)
    tho = _pick_tile(H_out, tile_m)
    tw2 = _pick_tile(W_out, tile_n)
    n_ho = pl.cdiv(H_out, tho)
    n_w2 = pl.cdiv(W_out, tw2)

    out = pl.pallas_call(
        _h_resize_kernel,
        out_shape=jax.ShapeDtypeStruct((C, H_out, W_out), x.dtype),
        grid=(C, n_w2, n_ho),  # ho innermost -> the (1, H_in, tw2) slab stays resident
        in_specs=[
            pl.BlockSpec((tho, 1), lambda c, w, ho: (ho, 0)),       # tiny i32 row-index column
            pl.BlockSpec((1, H_in, tw2), lambda c, w, ho: (c, 0, w)),
        ],
        out_specs=pl.BlockSpec((1, tho, tw2), lambda c, w, ho: (c, ho, w)),
        compiler_params=pltpu.CompilerParams(
            dimension_semantics=("parallel", "parallel", "parallel"),
        ),
    )(row_src, y3)

    return out


# ----------------------------------------------------------------------------- reference
def _reference_resize(x, scale_factor):
    """Pure-JAX gather reference mirroring PyTorch nearest semantics."""
    C, H_in, W_in = x.shape
    H_out = int(math.floor(H_in * scale_factor))
    W_out = int(math.floor(W_in * scale_factor))
    rows = jnp.asarray(_nearest_source_indices(H_out, H_in, scale_factor))
    cols = jnp.asarray(_nearest_source_indices(W_out, W_in, scale_factor))
    return x[:, rows, :][:, :, cols]


if __name__ == "__main__":
    # Deterministic "random" scale, matching RandomResize(scale=(0.5, 2.0)).get_random_scale()
    random.seed(0)
    scale_factor = random.uniform(0.5, 2.0)

    key = jax.random.PRNGKey(0)
    C, H, W = 4, 16, 16
    x = jax.random.normal(key, (C, H, W), dtype=jnp.float32)

    out = jax.block_until_ready(random_resize(x, scale_factor))

    ref = _reference_resize(x, scale_factor)
    assert out.shape == ref.shape, (out.shape, ref.shape)
    assert jnp.allclose(out, ref), "mismatch vs nearest-neighbor reference"

    print("KERNEL_OK")
</pallas_src>

<mosaic_0001>
module attributes {stable_mosaic.version = 11 : i64} {
  func.func @_w_resize_kernel(%arg0: i32, %arg1: i32, %arg2: memref<1x28xi32, #tpu.memory_space<vmem>>, %arg3: memref<64x16xf32, #tpu.memory_space<vmem>>, %arg4: memref<64x28xf32, #tpu.memory_space<vmem>>) attributes {dimension_semantics = [#tpu.dimension_semantics<parallel>, #tpu.dimension_semantics<parallel>], iteration_bounds = array<i64: 1, 1>, scalar_prefetch = 0 : i64, scratch_operands = 0 : i64, tpu.core_type = #tpu.core_type<tc>, window_params = [{transform_indices = @transform_0, window_bounds = array<i64: 1, 28>}, {transform_indices = @transform_1, window_bounds = array<i64: 64, 16>}, {transform_indices = @transform_2, window_bounds = array<i64: 64, 28>}]} {
    %0 = tpu.iota {dimensions = array<i32: 0>} : vector<16x28xi32>
    %c0 = arith.constant 0 : index
    %c0_0 = arith.constant 0 : index
    %1 = vector.load %arg2[%c0, %c0_0] : memref<1x28xi32, #tpu.memory_space<vmem>>, vector<1x28xi32>
    %2 = vector.broadcast %1 : vector<1x28xi32> to vector<16x28xi32>
    %3 = arith.cmpi eq, %0, %2 : vector<16x28xi32>
    %4 = arith.extui %3 : vector<16x28xi1> to vector<16x28xi32>
    %5 = arith.sitofp %4 : vector<16x28xi32> to vector<16x28xf32>
    %c0_1 = arith.constant 0 : index
    %c0_2 = arith.constant 0 : index
    %6 = vector.load %arg3[%c0_1, %c0_2] : memref<64x16xf32, #tpu.memory_space<vmem>>, vector<64x16xf32>
    %cst = arith.constant dense<0.000000e+00> : vector<64x28xf32>
    %7 = tpu.matmul %6, %5, %cst {dimension_numbers = #tpu.dot_dimension_numbers<[1], [0], [0], [1], [0, 0, 1, 1], [], []>, precision = #tpu.contract_precision<fp32>} : vector<64x16xf32>, vector<16x28xf32>, vector<64x28xf32> -> vector<64x28xf32>
    %c0_3 = arith.constant 0 : index
    %c0_4 = arith.constant 0 : index
    %8 = vector.load %arg4[%c0_3, %c0_4] : memref<64x28xf32, #tpu.memory_space<vmem>>, vector<64x28xf32>
    tpu.vector_store %arg4[%c0_3, %c0_4], %7 {strides = array<i32>} : memref<64x28xf32, #tpu.memory_space<vmem>>, vector<64x28xf32>,
    return
  }
  func.func @transform_0(%arg0: i32, %arg1: i32) -> (i32, i32) {
    %c0_i32 = arith.constant 0 : i32
    %c0_i32_0 = arith.constant 0 : i32
    return %c0_i32, %arg1 : i32, i32
  }
  func.func @transform_1(%arg0: i32, %arg1: i32) -> (i32, i32) {
    %c0_i32 = arith.constant 0 : i32
    %c0_i32_0 = arith.constant 0 : i32
    return %arg0, %c0_i32 : i32, i32
  }
  func.func @transform_2(%arg0: i32, %arg1: i32) -> (i32, i32) {
    %c0_i32 = arith.constant 0 : i32
    return %arg0, %arg1 : i32, i32
  }
}

</mosaic_0001>

<bundles_post_ra>
// kernel: tpu_custom_call.1
= control target key start
LH: loop header
LB: loop body
LE: loop exit
PB: predicated region body
PF: predicated region fallthrough
CT: control target
= control target key end

     0   :  { %v11_v0 = vlaneseq  ;;  %vm33_vm0 = vcmask 130048   ;;  %v1062_v17 = vmov 0.0   ;;  %v1063_v32 = vmov 1.0|1.0   ;;  %s1234_s0 = inlined_call_operand.vmem [shape: s32[1,28], index: 0, kind: input, shape index: {}]   ;;  %s1235_s1 = inlined_call_operand.vmem [shape: f32[64,16], index: 1, kind: input, shape index: {}]   ;;  %s1236_s2 = inlined_call_operand.vmem [shape: f32[64,28], index: 2, kind: output, shape index: {}]  }
   0x1   :  { %v831_v1 = vld [vmem:[%s1234_s0] ss:$0 sm:$0xff]  ;;  %v26_v3 = vld [vmem:[%s1235_s1 + $0x8] sm:$0xff]  ;;  %v27_v7 = vld [vmem:[%s1235_s1 + $0x10] sm:$0xff]  ;;  %vm818_vm4 = vcmask 228352  }
   0x2   :  { %v25_v2 = vld [vmem:[%s1235_s1] sm:$0xff]  ;;  %v12_v4 = vshrl.u32 %v11_v0, 7  ;;  %v38_v6 = vsel %vm33_vm0, %v26_v3, 0  ;;  %v28_v8 = vld [vmem:[%s1235_s1 + $0x18] sm:$0xff]  ;;  %v41_v12 = vsel %vm33_vm0, %v27_v7, 0  ;;  %v30_v25 = vld [vmem:[%s1235_s1 + $0x28] sm:$0xff] }
   0x3   :  { %v35_v5 = vsel %vm33_vm0, %v25_v2, 0  ;;  %v29_v9 = vld [vmem:[%s1235_s1 + $0x20] sm:$0xff]  ;;  %v1101_v11 = vand.u32 4294901760, %v38_v6  ;;  %v44_v13 = vsel %vm33_vm0, %v28_v8, 0  ;;  %v1105_v15 = vand.u32 4294901760, %v41_v12  ;;  %v31_v44 = vld [vmem:[%s1235_s1 + $0x30] sm:$0xff] }
   0x4   :  { %v1099_v10 = vand.u32 4294901760, %v35_v5  ;;  %v13_v14 = vadd.s32 8, %v12_v4  ;;  %vm19_vm1 = vcmp.eq.s32.totalorder %v12_v4, %v831_v1  ;;  %v1107_v16 = vand.u32 4294901760, %v44_v13  ;;  %v32_v49 = vld [vmem:[%s1235_s1 + $0x38] sm:$0xff] }
   0x5   :  { %v832_v18 = vsel %vm19_vm1, 1.0, %v1062_v17  ;;  %v1113_v20 = vsub.f32 %v38_v6, %v1101_v11  ;;  %v47_v21 = vsel %vm33_vm0, %v29_v9, 0  ;;  %v1117_v23 = vsub.f32 %v41_v12, %v1105_v15 }
   0x6   :  { %v1110_v19 = vsub.f32 %v35_v5, %v1099_v10  ;;  %vm20_vm2 = vcmp.eq.s32.totalorder %v13_v14, %v831_v1  ;;  %v207_v22 = vsub.f32 %v832_v18, %v832_v18  ;;  %v1120_v24 = vsub.f32 %v44_v13, %v1107_v16 }
   0x7   :  { %v833_v26 = vsel %vm20_vm2, 1.0, %v1062_v17  ;;  %vm1125_vm3 = vmpackc.low %vm20_vm2, %vm19_vm1  ;;  %v137_v29 = vand.u32 4294901760, %v1113_v20  ;;  %v1131_v30 = vand.u32 4294901760, %v47_v21  ;;  %v147_v33 = vand.u32 4294901760, %v1117_v23 }
   0x8   :  { %v127_v28 = vand.u32 4294901760, %v1110_v19  ;;  %v214_v31 = vsub.f32 %v833_v26, %v833_v26  ;;  %1009 = vmatprep.subr.msk.bf16.mxu0 %vm1125_vm3, %v1063_v32  ;;  %997 = vmatprep.subr.msk.bf16.mxu1 %vm1125_vm3, %v1063_v32  ;;  %v157_v34 = vand.u32 4294901760, %v1120_v24  ;;  %v208_v35 = vand.u32 4294901760, %v207_v22 }
   0x9   :  { %1011 = vmatpush3.bf16.msk.msra.mxu0 %vm1125_vm3, %v1063_v32  ;;  %999 = vmatpush3.bf16.msk.msra.mxu1 %vm1125_vm3, %v1063_v32  ;;  %v138_v37 = vsub.f32 %v1113_v20, %v137_v29  ;;  %v1150_v38 = vsub.f32 %v47_v21, %v1131_v30  ;;  %v50_v39 = vsel %vm33_vm0, %v30_v25, 0  ;;  %v148_v40 = vsub.f32 %v1117_v23, %v147_v33 }
   0xa   :  { %v128_v36 = vsub.f32 %v1110_v19, %v127_v28  ;;  %952 = vmatprep.mubr.f32.mxu0 %v127_v28  ;;  %v158_v41 = vsub.f32 %v1120_v24, %v157_v34  ;;  %v209_v42 = vsub.f32 %v207_v22, %v208_v35  ;;  %v215_v43 = vand.u32 4294901760, %v214_v31 }
   0xb   :  { %v139_v46 = vand.u32 4294901760, %v138_v37  ;;  %v167_v47 = vand.u32 4294901760, %v1150_v38  ;;  %v1159_v48 = vand.u32 4294901760, %v50_v39  ;;  %v149_v50 = vand.u32 4294901760, %v148_v40 }
   0xc   :  { %v129_v45 = vand.u32 4294901760, %v128_v36  ;;  %953 = vmatmul.mubr.f32.vlgmr.msra.gmra.mrb[0].mxu0 %v137_v29  ;;  %v210_v51 = vand.u32 4294901760, %v209_v42  ;;  %v216_v52 = vsub.f32 %v214_v31, %v215_v43  ;;  %v1012_v53 = vpack.c.bf16 %v215_v43, %v208_v35 }
   0xd   :  { %955 = vmatprep.mubr.f32.mxu0 %v147_v33  ;;  %v1165_v54 = vsub.f32 %v50_v39, %v1159_v48  ;;  %v168_v55 = vsub.f32 %v1150_v38, %v167_v47  ;;  %v53_v56 = vsel %vm33_vm0, %v31_v44, 0  ;;  %v159_v57 = vand.u32 4294901760, %v158_v41 }
   0xe   :  { %904 = vmatprep.mubr.f32.mxu1 %v129_v45  ;;  %v217_v58 = vand.u32 4294901760, %v216_v52  ;;  %v185_v59 = vand.u32 4294901760, %v53_v56  ;;  %v56_v60 = vsel %vm33_vm0, %v32_v49, 0  ;;  %1013 = vmatprep.subr.bf16.mxu0 %v1012_v53  ;;  %v1004_v2 = vpack.c.bf16 %v214_v31, %v207_v22 }
   0xf   :  { %905 = vmatmul.mubr.f32.vlgmr.msra.gmra.mrb[0].mxu1 %v139_v46  ;;  %v177_v61 = vand.u32 4294901760, %v1165_v54  ;;  %v169_v62 = vand.u32 4294901760, %v168_v55  ;;  %v195_v63 = vand.u32 4294901760, %v56_v60  ;;  %1015 = vmatpush3.bf16.msra.mxu0 %v1012_v53 }
  0x10   :  { %907 = vmatprep.mubr.f32.mxu1 %v149_v50  ;;  %956 = vmatmul.mubr.f32.gmra.mrb[2].mxu0 %v157_v34  ;;  %v1000_v0 = vpack.c.bf16 %v217_v58, %v210_v51  ;;  %v186_v1 = vsub.f32 %v53_v56, %v185_v59 }
  0x11   :  { %958 = vmatprep.mubr.f32.mxu0 %v167_v47  ;;  %v178_v3 = vsub.f32 %v1165_v54, %v177_v61  ;;  %v196_v4 = vsub.f32 %v56_v60, %v195_v63  ;;  %1017 = vmatprep.subr.msk.bf16.mxu0 %vm1125_vm3, %v1063_v32 }
  0x12   :  { %1001 = vmatprep.subr.bf16.mxu1 %v1000_v0  ;;  %v187_v5 = vand.u32 4294901760, %v186_v1 }
  0x13   :  { %908 = vmatmul.mubr.f32.gmra.mrb[2].mxu1 %v159_v57  ;;  %v179_v6 = vand.u32 4294901760, %v178_v3  ;;  %v197_v7 = vand.u32 4294901760, %v196_v4 }
  0x14   :  { %1003 = vmatpush3.bf16.msra.mxu1 %v1000_v0  ;;  %910 = vmatprep.mubr.f32.mxu1 %v169_v62  ;;  %v188_v8 = vsub.f32 %v186_v1, %v187_v5 }
  0x15   :  { %959 = vmatmul.mubr.f32.gmra.mrb[4].mxu0 %v177_v61  ;;  %1005 = vmatprep.subr.bf16.mxu1 %v1004_v2  ;;  %v198_v9 = vsub.f32 %v196_v4, %v197_v7 }
  0x16   :  { %961 = vmatprep.mubr.f32.mxu0 %v187_v5  ;;  %v189_v12 = vand.u32 4294901760, %v188_v8 }
  0x17   :  { %911 = vmatmul.mubr.f32.gmra.mrb[4].mxu1 %v179_v6  ;;  %v199_v13 = vand.u32 4294901760, %v198_v9 }
  0x18   :  { %913 = vmatprep.mubr.f32.mxu1 %v189_v12 }
  0x19   :  { %962 = vmatmul.mubr.f32.gmra.mrb[6].mxu0 %v197_v7 }
  0x1a   :  { %968 = vmatprep.mubr.f32.mxu0 %v1099_v10 }
  0x1b   :  { %914 = vmatmul.mubr.f32.gmra.mrb[6].mxu1 %v199_v13 }
  0x1c   :  { %920 = vmatprep.mubr.f32.mxu1 %v1099_v10 }
  0x1d   :  { %969 = vmatmul.mubr.f32.vlgmr.msra.gmra.mrb[0].mxu0 %v1101_v11 }
  0x1e   :  { %971 = vmatprep.mubr.f32.mxu0 %v1105_v15  ;;  %1019 = vmatpush3.bf16.msk.msra.mxu0 %vm1125_vm3, %v1063_v32 }
  0x1f   :  { %921 = vmatmul.mubr.f32.vlgmr.msra.gmra.mrb[0].mxu1 %v1101_v11 }
  0x20   :  { %923 = vmatprep.mubr.f32.mxu1 %v1105_v15  ;;  %1007 = vmatpush3.bf16.msra.mxu1 %v1004_v2 }
  0x21   :  { %972 = vmatmul.mubr.f32.gmra.mrb[2].mxu0 %v1107_v16 }
  0x22   :  { %974 = vmatprep.mubr.f32.mxu0 %v1131_v30 }
  0x23   :  { %924 = vmatmul.mubr.f32.gmra.mrb[2].mxu1 %v1107_v16 }
  0x24   :  { %926 = vmatprep.mubr.f32.mxu1 %v1131_v30 }
  0x25   :  { %975 = vmatmul.mubr.f32.gmra.mrb[4].mxu0 %v1159_v48 }
  0x26   :  { %977 = vmatprep.mubr.f32.mxu0 %v185_v59 }
  0x27   :  { %927 = vmatmul.mubr.f32.gmra.mrb[4].mxu1 %v1159_v48 }
  0x28   :  { %929 = vmatprep.mubr.f32.mxu1 %v185_v59 }
  0x29   :  { %978 = vmatmul.mubr.f32.gmra.mrb[6].mxu0 %v195_v63 }
  0x2a   :  { %984 = vmatprep.mubr.f32.mxu0 %v1099_v10 }
  0x2b   :  { %930 = vmatmul.mubr.f32.gmra.mrb[6].mxu1 %v195_v63 }
  0x2c   :  { %936 = vmatprep.mubr.f32.mxu1 %v1110_v19 }
  0x2d   :  { %985 = vmatmul.mubr.f32.vlgmr.msra.gmra.mrb[0].mxu0 %v1101_v11 }
  0x2e   :  { %987 = vmatprep.mubr.f32.mxu0 %v1105_v15 }
  0x2f   :  { %937 = vmatmul.mubr.f32.vlgmr.msra.gmra.mrb[0].mxu1 %v1113_v20 }
  0x30   :  { %939 = vmatprep.mubr.f32.mxu1 %v1117_v23 }
  0x31   :  { %988 = vmatmul.mubr.f32.gmra.mrb[2].mxu0 %v1107_v16 }
  0x32   :  { %990 = vmatprep.mubr.f32.mxu0 %v1131_v30 }
  0x33   :  { %940 = vmatmul.mubr.f32.gmra.mrb[2].mxu1 %v1120_v24 }
  0x34   :  { %942 = vmatprep.mubr.f32.mxu1 %v1150_v38 }
  0x35   :  { %991 = vmatmul.mubr.f32.gmra.mrb[4].mxu0 %v1159_v48 }
  0x36   :  { %993 = vmatprep.mubr.f32.mxu0 %v185_v59 }
  0x37   :  { %943 = vmatmul.mubr.f32.gmra.mrb[4].mxu1 %v1165_v54 }
  0x38   :  { %945 = vmatprep.mubr.f32.mxu1 %v186_v1 }
  0x39   :  { %994 = vmatmul.mubr.f32.gmra.mrb[6].mxu0 %v195_v63 }
  0x3b   :  { %946 = vmatmul.mubr.f32.gmra.mrb[6].mxu1 %v196_v4 }
 0x100   :  { %v986_v10 = vpop.f32.mrb[0].mxu0 }
 0x101   :  { %v772_v11 = vpop.f32.mrb[1].mxu0 }
 0x102   :  { %v938_v14 = vpop.f32.mrb[0].mxu1 }
 0x103   :  { %v1020_v15 = vadd.f32 %v986_v10, %v938_v14  ;;  %v400_v16 = vpop.f32.mrb[1].mxu1 }
 0x104   :  { %v1021_v17 = vadd.f32 %v772_v11, %v400_v16  ;;  %v989_v18 = vpop.f32.mrb[2].mxu0 }
 0x105   :  { %820 = vst.msk [vmem:[%s1236_s2 + $0x8] sm:$0xff] %vm818_vm4, %v1020_v15  ;;  %v784_v19 = vpop.f32.mrb[3].mxu0 }
 0x106   :  { %819 = vst.msk [vmem:[%s1236_s2] sm:$0xff] %vm818_vm4, %v1021_v17  ;;  %v941_v20 = vpop.f32.mrb[2].mxu1 }
 0x107   :  { %v1022_v21 = vadd.f32 %v989_v18, %v941_v20  ;;  %v414_v22 = vpop.f32.mrb[3].mxu1 }
 0x108   :  { %v1023_v23 = vadd.f32 %v784_v19, %v414_v22  ;;  %v992_v24 = vpop.f32.mrb[4].mxu0 }
 0x109   :  { %822 = vst.msk [vmem:[%s1236_s2 + $0x18] sm:$0xff] %vm818_vm4, %v1022_v21  ;;  %v796_v25 = vpop.f32.mrb[5].mxu0 }
 0x10a   :  { %821 = vst.msk [vmem:[%s1236_s2 + $0x10] sm:$0xff] %vm818_vm4, %v1023_v23  ;;  %v944_v26 = vpop.f32.mrb[4].mxu1 }
 0x10b   :  { %v1024_v27 = vadd.f32 %v992_v24, %v944_v26  ;;  %v428_v28 = vpop.f32.mrb[5].mxu1 }
 0x10c   :  { %v1025_v29 = vadd.f32 %v796_v25, %v428_v28  ;;  %v995_v30 = vpop.f32.mrb[6].mxu0 }
 0x10d   :  { %824 = vst.msk [vmem:[%s1236_s2 + $0x28] sm:$0xff] %vm818_vm4, %v1024_v27  ;;  %v808_v31 = vpop.f32.mrb[7].mxu0 }
 0x10e   :  { %823 = vst.msk [vmem:[%s1236_s2 + $0x20] sm:$0xff] %vm818_vm4, %v1025_v29  ;;  %v947_v32 = vpop.f32.mrb[6].mxu1 }
 0x10f   :  { %v1026_v33 = vadd.f32 %v995_v30, %v947_v32  ;;  %v442_v34 = vpop.f32.mrb[7].mxu1 }
 0x110   :  { %v1027_v35 = vadd.f32 %v808_v31, %v442_v34 }
 0x111   :  { %826 = vst.msk [vmem:[%s1236_s2 + $0x38] sm:$0xff] %vm818_vm4, %v1026_v33 }
 0x112   :  { %825 = vst.msk [vmem:[%s1236_s2 + $0x30] sm:$0xff] %vm818_vm4, %v1027_v35 }

</bundles_post_ra>
